<compile_context>
chip_gen: v7x
topology: tpu7x:2x2x1
jax: 0.10.0
libtpu: 0.0.40
codegen_flags: <defaults>
</compile_context>

<pallas_src>
import functools

import jax
import jax.numpy as jnp
from jax.experimental import pallas as pl
from jax.experimental.pallas import tpu as pltpu


LANE = 128       # vreg lane width: feature dims padded to this (lane-dense stores)
SUBLANE = 8      # vreg sublane width: row tiles are multiples of this


def _round_up(x, m):
    return ((x + m - 1) // m) * m


def _pad_axis(a, target, axis):
    pad = target - a.shape[axis]
    if pad == 0:
        return a
    widths = [(0, 0)] * a.ndim
    widths[axis] = (0, pad)
    return jnp.pad(a, widths)


def _vmem_capacity_bytes():
    """Per-core VMEM capacity (128 MiB on v5e/v6e, 64 MiB per-TC on v7x)."""
    try:
        cap = int(getattr(pltpu.get_tpu_info(), "vmem_capacity_bytes", 0))
        if cap > 0:
            return cap
    except Exception:
        pass
    return 64 << 20   # conservative default = v7x per-TensorCore VMEM


def _mlp_kernel(num_layers, *refs):
    """refs = (x_ref, w0, b0, w1, b1, ..., o_ref).

    x_ref / o_ref are row tiles streamed (double-buffered) through VMEM;
    weight/bias refs are whole arrays resident in VMEM as a single copy.
    """
    x_ref = refs[0]
    o_ref = refs[-1]
    params = refs[1:-1]

    h = x_ref[...]                                       # bf16 rows feed the MXU
    for i in range(num_layers):
        w_ref = params[2 * i]
        b_ref = params[2 * i + 1]
        # bf16 x bf16 matmul with f32 accumulation; bias add + ReLU stay in f32.
        acc = jnp.dot(h, w_ref[...], preferred_element_type=jnp.float32)
        acc = acc + b_ref[...]
        if i < num_layers - 1:
            h = jnp.maximum(acc, 0.0).astype(jnp.bfloat16)   # ReLU on all but last
        else:
            h = acc
    o_ref[...] = h.astype(o_ref.dtype)
    # TODO(synk): for very large hidden dims on v7x, chunk each layer's N
    # dimension (~512-wide) so the live f32 accumulator stays small.


def mlp_forward(x, weights, biases, *, row_tile=None, out_dtype=None):
    """x: [B, N, input_dim]; weights[i]: [in_i, out_i]; biases[i]: [1, out_i]."""
    num_layers = len(weights)
    B, N, d_in = x.shape
    d_out = weights[-1].shape[1]
    M = B * N
    out_dtype = x.dtype if out_dtype is None else jnp.dtype(out_dtype)
    out_bytes = jnp.dtype(out_dtype).itemsize

    # ---- lane padding of all feature dims to multiples of 128 -------------
    dims = [d_in] + [w.shape[1] for w in weights]
    pdims = [_round_up(d, LANE) for d in dims]
    d_in_p, d_out_p = pdims[0], pdims[-1]

    w_p, b_p = [], []
    for i, (w, b) in enumerate(zip(weights, biases)):
        w_p.append(_pad_axis(_pad_axis(w, pdims[i], 0), pdims[i + 1], 1)
                   .astype(jnp.bfloat16))
        b_p.append(_pad_axis(b, pdims[i + 1], 1).astype(jnp.float32))

    # No row padding: grid = cdiv(M, row_tile); boundary block stores are masked.
    x2d = _pad_axis(x.reshape(M, d_in).astype(jnp.bfloat16), d_in_p, 1)

    # ---- generation-aware VMEM accounting & row-tile selection ------------
    vmem_cap = _vmem_capacity_bytes()
    safe_cap = int(vmem_cap * 0.78)   # ~50 MiB on v7x, ~100 MiB on v5e/v6e

    # single-buffered resident params (memory_space=VMEM => exactly one copy)
    resident_bytes = sum(w.size * 2 for w in w_p) + sum(b.size * 4 for b in b_p)

    def budget(rt):
        stream = 2 * rt * d_in_p * 2 + 2 * rt * d_out_p * out_bytes  # dbl-buffered x/out
        interm = 2 * rt * max(pdims) * (2 + 4)                       # bf16 h + f32 acc (+slack)
        return resident_bytes + stream + interm

    if row_tile is None:
        # bigger tiles on 128 MiB parts (amortize ~0.35us/step); modest on v7x
        row_tile = 512 if vmem_cap >= (96 << 20) else 256
    # keep >= 2 grid steps (megacore sharding on v7x, DMA/compute overlap everywhere)
    if M > SUBLANE:
        row_tile = min(row_tile, _round_up(pl.cdiv(M, 2), SUBLANE))
    row_tile = min(row_tile, _round_up(M, SUBLANE))
    row_tile = max(_round_up(row_tile, SUBLANE), SUBLANE)
    while row_tile > SUBLANE and budget(row_tile) > safe_cap:
        row_tile = max(_round_up(row_tile // 2, SUBLANE), SUBLANE)
    if budget(row_tile) > safe_cap:
        # TODO(synk): K/N-tiled grid with a VMEM f32 accumulator for models whose
        # resident weights overflow per-core VMEM (needed on v7x for huge FFNs).
        raise ValueError(
            f"MLP params ({resident_bytes / 2**20:.1f} MiB) exceed the "
            f"resident-weight VMEM budget ({safe_cap / 2**20:.1f} MiB)")

    grid = (pl.cdiv(M, row_tile),)
    vmem_limit = int(min(safe_cap,
                         max(int(budget(row_tile) * 1.25) + (2 << 20), 32 << 20)))

    # ---- specs -------------------------------------------------------------
    in_specs = [pl.BlockSpec((row_tile, d_in_p), lambda i: (i, 0))]
    args = [x2d]
    resident_spec = pl.BlockSpec(memory_space=pltpu.MemorySpace.VMEM)
    for wp, bp in zip(w_p, b_p):
        in_specs.append(resident_spec)   # whole array, single copy in VMEM
        in_specs.append(resident_spec)
        args.append(wp)
        args.append(bp)
    out_spec = pl.BlockSpec((row_tile, d_out_p), lambda i: (i, 0))

    # ---- scheduler hint ----------------------------------------------------
    flops = 2 * M * sum(pdims[i] * pdims[i + 1] for i in range(num_layers))
    bytes_accessed = x2d.size * 2 + resident_bytes + M * d_out_p * out_bytes
    cost = pl.CostEstimate(flops=flops, transcendentals=0,
                           bytes_accessed=bytes_accessed)

    out = pl.pallas_call(
        functools.partial(_mlp_kernel, num_layers),
        out_shape=jax.ShapeDtypeStruct((M, d_out_p), out_dtype),
        grid_spec=pltpu.PrefetchScalarGridSpec(
            num_scalar_prefetch=0,
            grid=grid,
            in_specs=in_specs,
            out_specs=out_spec,
        ),
        compiler_params=pltpu.CompilerParams(
            dimension_semantics=("parallel",),
            vmem_limit_bytes=vmem_limit,
        ),
        cost_estimate=cost,
    )(*args)

    if d_out_p != d_out:
        out = out[:, :d_out]
    return out.reshape(B, N, d_out)


def init_mlp_params(key, input_dim, hidden_dim, output_dim, num_layers):
    """Deterministic init mirroring nn.Linear (U(-1/sqrt(fan_in), +))."""
    h = [hidden_dim] * (num_layers - 1)
    dims_in = [input_dim] + h
    dims_out = h + [output_dim]
    weights, biases = [], []
    for n, k in zip(dims_in, dims_out):
        key, kw, kb = jax.random.split(key, 3)
        bound = 1.0 / (n ** 0.5)
        # stored pre-transposed as [in, out] for the kernel (PyTorch keeps [out, in])
        weights.append(jax.random.uniform(kw, (n, k), jnp.float32, -bound, bound))
        biases.append(jax.random.uniform(kb, (1, k), jnp.float32, -bound, bound))
    return weights, biases


def mlp_reference(x, weights, biases):
    """Plain-JAX f32 reference matching the PyTorch forward."""
    num_layers = len(weights)
    h = x
    for i, (w, b) in enumerate(zip(weights, biases)):
        h = jnp.dot(h, w) + b
        if i < num_layers - 1:
            h = jnp.maximum(h, 0.0)
    return h


if __name__ == "__main__":
    key = jax.random.PRNGKey(0)

    # Small shapes consistent with the module: batch=2, seq(queries)=8,
    # input_dim=32, hidden_dim=32, output_dim=8, num_layers=3.
    B, N = 2, 8
    input_dim, hidden_dim, output_dim, num_layers = 32, 32, 8, 3

    key, kx = jax.random.split(key)
    x = jax.random.normal(kx, (B, N, input_dim), jnp.float32)

    weights, biases = init_mlp_params(key, input_dim, hidden_dim, output_dim,
                                      num_layers)

    out = mlp_forward(x, weights, biases)
    out = jax.block_until_ready(out)

    ref = mlp_reference(x, weights, biases)
    assert out.shape == (B, N, output_dim), out.shape
    # bf16 operands with f32 accumulation -> tolerance loosened vs pure f32.
    assert jnp.allclose(out, ref, atol=5e-2, rtol=5e-2), "mismatch vs reference"

    print("KERNEL_OK")
</pallas_src>

<mosaic_0001>
module attributes {stable_mosaic.version = 11 : i64} {
  func.func @_mlp_kernel(%arg0: i32, %arg1: memref<8x128xbf16, #tpu.memory_space<vmem>>, %arg2: memref<128x128xbf16, #tpu.memory_space<vmem>>, %arg3: memref<1x128xf32, #tpu.memory_space<vmem>>, %arg4: memref<128x128xbf16, #tpu.memory_space<vmem>>, %arg5: memref<1x128xf32, #tpu.memory_space<vmem>>, %arg6: memref<128x128xbf16, #tpu.memory_space<vmem>>, %arg7: memref<1x128xf32, #tpu.memory_space<vmem>>, %arg8: memref<8x128xf32, #tpu.memory_space<vmem>>) attributes {dimension_semantics = [#tpu.dimension_semantics<parallel>], iteration_bounds = array<i64: 2>, scalar_prefetch = 0 : i64, scratch_operands = 0 : i64, tpu.core_type = #tpu.core_type<tc>, window_params = [{transform_indices = @transform_0, window_bounds = array<i64: 8, 128>}, {pipeline_mode = #tpu.pipeline_mode<synchronous>, transform_indices = @transform_1, window_bounds = array<i64: 128, 128>}, {pipeline_mode = #tpu.pipeline_mode<synchronous>, transform_indices = @transform_2, window_bounds = array<i64: 1, 128>}, {pipeline_mode = #tpu.pipeline_mode<synchronous>, transform_indices = @transform_3, window_bounds = array<i64: 128, 128>}, {pipeline_mode = #tpu.pipeline_mode<synchronous>, transform_indices = @transform_4, window_bounds = array<i64: 1, 128>}, {pipeline_mode = #tpu.pipeline_mode<synchronous>, transform_indices = @transform_5, window_bounds = array<i64: 128, 128>}, {pipeline_mode = #tpu.pipeline_mode<synchronous>, transform_indices = @transform_6, window_bounds = array<i64: 1, 128>}, {transform_indices = @transform_7, window_bounds = array<i64: 8, 128>}]} {
    %c0 = arith.constant 0 : index
    %c0_0 = arith.constant 0 : index
    %0 = vector.load %arg1[%c0, %c0_0] : memref<8x128xbf16, #tpu.memory_space<vmem>>, vector<8x128xbf16>
    %c0_1 = arith.constant 0 : index
    %c0_2 = arith.constant 0 : index
    %1 = vector.load %arg2[%c0_1, %c0_2] : memref<128x128xbf16, #tpu.memory_space<vmem>>, vector<128x128xbf16>
    %cst = arith.constant dense<0.000000e+00> : vector<8x128xf32>
    %2 = tpu.matmul %0, %1, %cst {dimension_numbers = #tpu.dot_dimension_numbers<[1], [0], [0], [1], [0, 0, 1, 1], [], []>} : vector<8x128xbf16>, vector<128x128xbf16>, vector<8x128xf32> -> vector<8x128xf32>
    %c0_3 = arith.constant 0 : index
    %c0_4 = arith.constant 0 : index
    %3 = vector.load %arg3[%c0_3, %c0_4] : memref<1x128xf32, #tpu.memory_space<vmem>>, vector<1x128xf32>
    %4 = vector.broadcast %3 : vector<1x128xf32> to vector<8x128xf32>
    %5 = arith.addf %2, %4 : vector<8x128xf32>
    %cst_5 = arith.constant 0.000000e+00 : f32
    %6 = vector.broadcast %cst_5 : f32 to vector<8x128xf32>
    %7 = arith.maximumf %5, %6 : vector<8x128xf32>
    %8 = arith.truncf %7 : vector<8x128xf32> to vector<8x128xbf16>
    %c0_6 = arith.constant 0 : index
    %c0_7 = arith.constant 0 : index
    %9 = vector.load %arg4[%c0_6, %c0_7] : memref<128x128xbf16, #tpu.memory_space<vmem>>, vector<128x128xbf16>
    %cst_8 = arith.constant dense<0.000000e+00> : vector<8x128xf32>
    %10 = tpu.matmul %8, %9, %cst_8 {dimension_numbers = #tpu.dot_dimension_numbers<[1], [0], [0], [1], [0, 0, 1, 1], [], []>} : vector<8x128xbf16>, vector<128x128xbf16>, vector<8x128xf32> -> vector<8x128xf32>
    %c0_9 = arith.constant 0 : index
    %c0_10 = arith.constant 0 : index
    %11 = vector.load %arg5[%c0_9, %c0_10] : memref<1x128xf32, #tpu.memory_space<vmem>>, vector<1x128xf32>
    %12 = vector.broadcast %11 : vector<1x128xf32> to vector<8x128xf32>
    %13 = arith.addf %10, %12 : vector<8x128xf32>
    %cst_11 = arith.constant 0.000000e+00 : f32
    %14 = vector.broadcast %cst_11 : f32 to vector<8x128xf32>
    %15 = arith.maximumf %13, %14 : vector<8x128xf32>
    %16 = arith.truncf %15 : vector<8x128xf32> to vector<8x128xbf16>
    %c0_12 = arith.constant 0 : index
    %c0_13 = arith.constant 0 : index
    %17 = vector.load %arg6[%c0_12, %c0_13] : memref<128x128xbf16, #tpu.memory_space<vmem>>, vector<128x128xbf16>
    %cst_14 = arith.constant dense<0.000000e+00> : vector<8x128xf32>
    %18 = tpu.matmul %16, %17, %cst_14 {dimension_numbers = #tpu.dot_dimension_numbers<[1], [0], [0], [1], [0, 0, 1, 1], [], []>} : vector<8x128xbf16>, vector<128x128xbf16>, vector<8x128xf32> -> vector<8x128xf32>
    %c0_15 = arith.constant 0 : index
    %c0_16 = arith.constant 0 : index
    %19 = vector.load %arg7[%c0_15, %c0_16] : memref<1x128xf32, #tpu.memory_space<vmem>>, vector<1x128xf32>
    %20 = vector.broadcast %19 : vector<1x128xf32> to vector<8x128xf32>
    %21 = arith.addf %18, %20 : vector<8x128xf32>
    %c0_17 = arith.constant 0 : index
    %c0_18 = arith.constant 0 : index
    %22 = vector.load %arg8[%c0_17, %c0_18] : memref<8x128xf32, #tpu.memory_space<vmem>>, vector<8x128xf32>
    tpu.vector_store %arg8[%c0_17, %c0_18], %21 {strides = array<i32>} : memref<8x128xf32, #tpu.memory_space<vmem>>, vector<8x128xf32>,
    return
  }
  func.func @transform_0(%arg0: i32) -> (i32, i32) {
    %c0_i32 = arith.constant 0 : i32
    %c0_i32_0 = arith.constant 0 : i32
    return %arg0, %c0_i32 : i32, i32
  }
  func.func @transform_1(%arg0: i32) -> (i32, i32) {
    %c0_i32 = arith.constant 0 : i32
    %c0_i32_0 = arith.constant 0 : i32
    %c0_i32_1 = arith.constant 0 : i32
    return %c0_i32, %c0_i32_0 : i32, i32
  }
  func.func @transform_2(%arg0: i32) -> (i32, i32) {
    %c0_i32 = arith.constant 0 : i32
    %c0_i32_0 = arith.constant 0 : i32
    %c0_i32_1 = arith.constant 0 : i32
    return %c0_i32, %c0_i32_0 : i32, i32
  }
  func.func @transform_3(%arg0: i32) -> (i32, i32) {
    %c0_i32 = arith.constant 0 : i32
    %c0_i32_0 = arith.constant 0 : i32
    %c0_i32_1 = arith.constant 0 : i32
    return %c0_i32, %c0_i32_0 : i32, i32
  }
  func.func @transform_4(%arg0: i32) -> (i32, i32) {
    %c0_i32 = arith.constant 0 : i32
    %c0_i32_0 = arith.constant 0 : i32
    %c0_i32_1 = arith.constant 0 : i32
    return %c0_i32, %c0_i32_0 : i32, i32
  }
  func.func @transform_5(%arg0: i32) -> (i32, i32) {
    %c0_i32 = arith.constant 0 : i32
    %c0_i32_0 = arith.constant 0 : i32
    %c0_i32_1 = arith.constant 0 : i32
    return %c0_i32, %c0_i32_0 : i32, i32
  }
  func.func @transform_6(%arg0: i32) -> (i32, i32) {
    %c0_i32 = arith.constant 0 : i32
    %c0_i32_0 = arith.constant 0 : i32
    %c0_i32_1 = arith.constant 0 : i32
    return %c0_i32, %c0_i32_0 : i32, i32
  }
  func.func @transform_7(%arg0: i32) -> (i32, i32) {
    %c0_i32 = arith.constant 0 : i32
    %c0_i32_0 = arith.constant 0 : i32
    return %arg0, %c0_i32 : i32, i32
  }
}

</mosaic_0001>

<bundles_post_ra>
// kernel: tpu_custom_call.1
= control target key start
LH: loop header
LB: loop body
LE: loop exit
PB: predicated region body
PF: predicated region fallthrough
CT: control target
= control target key end

     0   :  { %12 = vsyncpa [#allocation3], 0  ;;  %s1573_s0 = inlined_call_operand.hbm [shape: bf16[16,128], index: 0, kind: input, shape index: {}]   ;;  %s1574_s1 = inlined_call_operand.hbm [shape: bf16[128,128], index: 1, kind: input, shape index: {}]   ;;  %s1575_s2 = inlined_call_operand.vmem [shape: f32[1,128], index: 2, kind: input, shape index: {}]   ;;  %s1576_s3 = inlined_call_operand.hbm [shape: bf16[128,128], index: 3, kind: input, shape index: {}]   ;;  %s1577_s4 = inlined_call_operand.vmem [shape: f32[1,128], index: 4, kind: input, shape index: {}]   ;;  %s1578_s5 = inlined_call_operand.hbm [shape: bf16[128,128], index: 5, kind: input, shape index: {}]   ;;  %s1579_s6 = inlined_call_operand.vmem [shape: f32[1,128], index: 6, kind: input, shape index: {}]   ;;  %s1580_s7 = inlined_call_operand.hbm [shape: f32[16,128], index: 7, kind: output, shape index: {}]  }
   0x1   :  { %14 = vsyncpa [#allocation3 + $0x1], 0 }
   0x2   :  { %15 = vsyncpa [#allocation6], 0 }
   0x3   :  { %16 = vsyncpa [#allocation9], 0 }
   0x4   :  { %17 = vsyncpa [#allocation4], 0 }
   0x5   :  { %19 = vsyncpa [#allocation4 + $0x1], 0  ;;  %s1267_s24 = smov 0   ;;  %s1269_s25 = smov 0  }
   0x6   :  { %s1271_s26 = smov 0   ;;  %s1273_s27 = smov 0  }
   0x7 LB: > { %s1288_s28 = sadd.s32 4294967295, %s1216_s27   ;;  %s791_s29 = sadd.s32 4294967294, %s1216_s27   ;;  %s1216_s27 = sphi %s1273_s27, %s1606_s27   ;;  %s1212_s26 = sphi %s1271_s26, %s1605_s26   ;;  %s1208_s25 = sphi %s1269_s25, %s1604_s25   ;;  %s1204_s24 = sphi %s1267_s24, %s1603_s24  }
   0x8   : > { %p45_p0 = scmp.ne.s32.totalorder %s1208_s25, %s1204_s24  ;;  %p1581_p1 = scmp.eq.s32.totalorder %s1288_s28, 0 }
   0x9   : > { %p201_p3 = scmp.eq.s32.totalorder %s791_s29, 1  ;;  %p792_p5 = scmp.ge.s32.totalorder %s1216_s27, 1 }
   0xa   : > { %p1297_p4 = por %p1581_p1, %p45_p0  ;;  %p208_p7 = scmp.lt.s32.totalorder %s1216_s27, 3 }
   0xb   : > { %p1302_p6 = por %p201_p3, %p45_p0  ;;  %s1218_s10 = smov [#allocation5]  }
   0xc   : > { %s1585_s30 = scalar_select %p1297_p4, 1, 0 }
   0xd   : > { %s1586_s8 = scalar_select %p1302_p6, 1, 0 }
   0xe   : > { %p1307_p8 = pnand %p792_p5, %p208_p7  ;;  %s220_s11 = sshll.u32 %s1218_s10, 4  ;;  %s1311_s11 = int_to_ptr.vmem [resolvable:$true] %s220_s11 }
   0xf   : > { %1587 = sst [smem:[#allocation15_spill]] %s1586_s8  ;;  %s1219_s13 = smov [#allocation7]  }
  0x10   : > { %s1588_s9 = scalar_select %p1307_p8, 1, 0 }
  0x11   : > { %p939_p9 = pneg %p1307_p8  ;;  %s236_s14 = sshll.u32 %s1219_s13, 4  ;;  %s1322_s14 = int_to_ptr.vmem [resolvable:$true] %s236_s14 }
  0x12   : > { %s1220_s15 = smov [#allocation8]   ;;  %s1028_s19 = scalar_lea.hbm %s1574_s1, 1024 }
  0x13   : > { %p1318_p11 = pnand %p939_p9, %p1581_p1  ;;  %s1324_s16 = sshll.u32 %s1220_s15, 4  ;;  %s253_s16 = int_to_ptr.vmem [resolvable:$true] %s1324_s16 }
  0x14   : > { %p1029_p12 = scmp.ne.s32.totalorder %s1574_s1, %s1028_s19  ;;  %p1035_p5 = scmp.lt.u32.totalorder %s1028_s19, %s1574_s1 }
  0x15   : > { %p1334_p13 = pneg %p1318_p11 }
  0x17   : > { %p1031_p0 = pnand %p1334_p13, %p1029_p12 }
  0x19   : > { %p1032_p3 = pneg %p1031_p0 }
  0x1b   : > { %p1037_p7 = pnand %p1035_p5, %p1032_p3 }
  0x1d   : > { %1040 = shalt.err (!%p1037_p7)
}
  0x1e   : > { %s1041_s10 = scalar_lea.vmem %s1311_s11, 1024  ;;  %p1049_p2 = scmp.lt.s32.totalorder %s1311_s11, %s1311_s11 }
  0x1f   : > { %p1042_p9 = scmp.ne.s32.totalorder %s1311_s11, %s1041_s10  ;;  %p1050_p6 = scmp.lt.s32.totalorder %s1041_s10, %s1041_s10 }
  0x21   : > { %p1044_p10 = pnand %p1042_p9, %p1334_p13  ;;  %p1051_p12 = por %p1050_p6, %p1049_p2 }
  0x23   : > { %p1045_p1 = pneg %p1044_p10 }
  0x25   : > { %p1052_p0 = pnand %p1051_p12, %p1045_p1 }
  0x27   : > { %1055 = shalt.err (!%p1052_p0)
}
  0x28   : > { %s1221_s13 = smov 64   ;;  %s1222_s15 = smov 4  }
  0x29   : > { %942 = dma.hbm_to_vmem [thread:$0]  (!%p1318_p11), %s1574_s1, 1024, %s1311_s11, [#allocation6], %s1221_s13, %s1221_s13, %s1222_s15  }
  0x2a   : > { %s1056_s21 = scalar_lea.hbm %s1576_s3, 1024 }
  0x2b   : > { %p1057_p1 = scmp.ne.s32.totalorder %s1576_s3, %s1056_s21  ;;  %p1063_p10 = scmp.lt.u32.totalorder %s1056_s21, %s1576_s3 }
  0x2d   : > { %p1059_p2 = pnand %p1057_p1, %p1334_p13 }
  0x2f   : > { %p1060_p6 = pneg %p1059_p2 }
  0x31   : > { %p1065_p3 = pnand %p1063_p10, %p1060_p6 }
  0x33   : > { %1068 = shalt.err (!%p1065_p3)
}
  0x34   : > { %s1069_s11 = scalar_lea.vmem %s1322_s14, 1024  ;;  %p1077_p12 = scmp.lt.s32.totalorder %s1322_s14, %s1322_s14 }
  0x35   : > { %p1070_p5 = scmp.ne.s32.totalorder %s1322_s14, %s1069_s11  ;;  %p1078_p0 = scmp.lt.s32.totalorder %s1069_s11, %s1069_s11 }
  0x37   : > { %p1072_p7 = pnand %p1070_p5, %p1334_p13  ;;  %p1079_p1 = por %p1078_p0, %p1077_p12 }
  0x39   : > { %p1073_p9 = pneg %p1072_p7 }
  0x3b   : > { %p1080_p2 = pnand %p1079_p1, %p1073_p9 }
  0x3d   : > { %1083 = shalt.err (!%p1080_p2)
}
  0x3e   : > { %945 = dma.hbm_to_vmem [thread:$0]  (!%p1318_p11), %s1576_s3, 1024, %s1322_s14, [#allocation6], %s1221_s13, %s1221_s13, %s1222_s15  }
  0x3f   : > { %s1084_s20 = scalar_lea.hbm %s1578_s5, 1024 }
  0x40   : > { %p1085_p6 = scmp.ne.s32.totalorder %s1578_s5, %s1084_s20  ;;  %p1091_p5 = scmp.lt.u32.totalorder %s1084_s20, %s1578_s5 }
  0x42   : > { %p1087_p10 = pnand %p1085_p6, %p1334_p13 }
  0x44   : > { %p1088_p3 = pneg %p1087_p10 }
  0x46   : > { %p1093_p7 = pnand %p1091_p5, %p1088_p3 }
  0x48   : > { %1096 = shalt.err (!%p1093_p7)
}
  0x49   : > { %s1097_s11 = scalar_lea.vmem %s253_s16, 1024  ;;  %p1105_p1 = scmp.lt.s32.totalorder %s253_s16, %s253_s16 }
  0x4a   : > { %p1098_p9 = scmp.ne.s32.totalorder %s253_s16, %s1097_s11  ;;  %p1106_p2 = scmp.lt.s32.totalorder %s1097_s11, %s1097_s11 }
  0x4c   : > { %p1100_p12 = pnand %p1098_p9, %p1334_p13  ;;  %p1107_p4 = por %p1106_p2, %p1105_p1 }
  0x4e   : > { %p1101_p0 = pneg %p1100_p12 }
  0x50   : > { %p1108_p8 = pnand %p1107_p4, %p1101_p0 }
  0x52   : > { %1111 = shalt.err (!%p1108_p8)
}
  0x53   : > { %948 = dma.hbm_to_vmem [thread:$0]  (!%p1318_p11), %s1578_s5, 1024, %s253_s16, [#allocation9], %s1221_s13, %s1221_s13, %s1222_s15  }
  0x54   : > { %s1407_s22 = sadd.s32 1, %s1216_s27   ;;  %s32_s17 = sadd.s32 1, %s1212_s26 }
  0x55   : > { %s29_s12 = ssub.s32 %s1216_s27, %s1407_s22  ;;  %p39_p8 = scmp.ne.s32.totalorder %s1212_s26, %s1208_s25 }
  0x56   : > { %p30_p4 = scmp.eq.s32.totalorder %s29_s12, 0  ;;  %p40_p13 = scmp.eq.s32.totalorder %s1216_s27, 0 }
  0x57   : > { %p960_p6 = scmp.lt.s32.totalorder %s1216_s27, 2  ;;  %p1591_p3 = scmp.eq.s32.totalorder %s1288_s28, 1 }
  0x58   : > { %s1417_s18 = scalar_select %p30_p4, %s1212_s26, %s32_s17  }
  0x59   : > { %p41_p10 = por %p40_p13, %p39_p8  ;;  %p1421_p5 = por %p1591_p3, %p39_p8 }
  0x5a   : > { %s269_s20 = sand.u32 1, %s1212_s26   ;;  %s798_s21 = sshll.u32 %s1216_s27, 6 }
  0x5b   : > { %s797_s16 = sshll.u32 %s269_s20, 2  ;;  %s1430_s23 = scalar_lea.hbm %s1573_s0, %s798_s21 }
  0x5c   : > { %s273_s29 = scalar_lea.vmem [#allocation2], %s797_s16  ;;  %p1432_p11 = pnand %p960_p6, %p41_p10 }
  0x5d   : > { %s280_s10 = sshll.u32 %s273_s29, 4  ;;  %s270_s14 = scalar_lea.sflag [#allocation3], %s269_s20  ;;  %s1436_s10 = int_to_ptr.vmem [resolvable:$true] %s280_s10 }
  0x5e   : > { %s1112_s8 = scalar_lea.hbm %s1430_s23, 64  ;;  %p1114_p9 = pneg %p1432_p11 }
  0x5f   : > { %p1113_p7 = scmp.ne.s32.totalorder %s1430_s23, %s1112_s8  ;;  %s1117_s21 = scalar_lea.hbm %s1573_s0, 128 }
  0x60   : > { %p1118_p1 = scmp.lt.u32.totalorder %s1430_s23, %s1573_s0  ;;  %p1119_p2 = scmp.lt.u32.totalorder %s1117_s21, %s1112_s8 }
  0x61   : > { %p1115_p12 = pnand %p1114_p9, %p1113_p7  ;;  %p1121_p8 = scmp.lt.u32.totalorder %s1112_s8, %s1430_s23 }
  0x62   : > { %p1120_p4 = por %p1119_p2, %p1118_p1 }
  0x63   : > { %p1116_p0 = pneg %p1115_p12 }
  0x64   : > { %p1122_p13 = por %p1121_p8, %p1120_p4 }
  0x66   : > { %p1123_p6 = pnand %p1122_p13, %p1116_p0 }
  0x68   : > { %1126 = shalt.err (!%p1123_p6)
}
  0x69   : > { %s1127_s20 = scalar_lea.vmem %s1436_s10, 64  ;;  %s1223_s15 = smov [#allocation2]  }
  0x6a   : > { %p1128_p10 = scmp.ne.s32.totalorder %s1436_s10, %s1127_s20  ;;  %s1132_s29 = sshll.u32 %s1223_s15, 4  ;;  %s1133_s29 = int_to_ptr.vmem [resolvable:$false] %s1132_s29 }
  0x6b   : > { %s1134_s12 = scalar_lea.vmem %s1133_s29, 128  ;;  %p1135_p12 = scmp.lt.s32.totalorder %s1436_s10, %s1133_s29 }
  0x6c   : > { %p1130_p3 = pnand %p1128_p10, %p1114_p9  ;;  %p1136_p1 = scmp.lt.s32.totalorder %s1134_s12, %s1127_s20 }
  0x6e   : > { %p1131_p7 = pneg %p1130_p3  ;;  %p1137_p2 = por %p1136_p1, %p1135_p12 }
  0x70   : > { %p1138_p4 = pnand %p1137_p2, %p1131_p7 }
  0x72   : > { %1141 = shalt.err (!%p1138_p4)
}
  0x73   : > { %952 = dma.hbm_to_vmem [thread:$0]  (!%p1432_p11), %s1430_s23, 64, %s1436_s10, %s270_s14  }
  0x74   : > { %p1594_p0 = scmp.ne.s32.totalorder %s1588_s9, 0 }
  0x75   : > { %s1466_s8 = sand.u32 (!%p1594_p0), 1, %s1208_s25   ;;  %p1595_p9 = scmp.ne.s32.totalorder (!%p1594_p0), %s1585_s30, 0 }
  0x76   : > { %289 = sbr.rel (%p1594_p0) target bundleno = 831 (0x33f), region = 48  ;;  %s800_s17 = sshll.u32 (!%p1594_p0), %s1466_s8, 2 }
  0x77   : > { %s292_s21 = scalar_lea.sflag (!%p1594_p0), [#allocation3], %s1466_s8  ;;  %s1470_s16 = scalar_lea.vmem (!%p1594_p0), [#allocation2], %s800_s17 }
  0x7d   : > { %1187 = dma.done.wait (%p1595_p9), %s292_s21, 64  }
  0x7e   : > { %1189 = vsyncadd (%p1595_p9), %s292_s21, 4294967232  ;;  %p1596_p11 = scmp.eq.s32.totalorder %s1288_s28, 0 }
  0x80   : > { %1191 = dma.done.wait (%p1596_p11), [#allocation6], 2048   ;;  %p1597_p8 = pmov %p1596_p11 }
  0x82   : > { %1193 = vsyncadd (%p1597_p8), [#allocation6], 4294965248  ;;  %p1598_p13 = pmov %p1597_p8 }
  0x83   : > { %p1599_p6 = pmov %p1597_p8 }
  0x84   : > { %1195 = dma.done.wait (%p1598_p13), [#allocation9], 1024  }
  0x85   : > { %1197 = vsyncadd (%p1599_p6), [#allocation9], 4294966272  ;;  %v1224_v0 = vmov 0.0   ;;  %vm1225_vm0 = vmmov 0   ;;  %v1004_v1 = vld [vmem:[#allocation5] sm:$0xff]   ;;  %v1005_v2 = vld [vmem:[#allocation5 + $0x8] sm:$0xff]  }
  0x86   : > { %863 = vmatprep.subr.bf16.mxu0 %v1224_v0  ;;  %879 = vmatprep.mubr.msk.bf16.mxu0 %vm1225_vm0, %v1224_v0  ;;  %v1006_v3 = vld [vmem:[#allocation5 + $0x10] sm:$0xff]   ;;  %v1012_v4 = vld [vmem:[#allocation7] sm:$0xff]   ;;  %v1007_v5 = vld [vmem:[#allocation5 + $0x18] sm:$0xff]   ;;  %s804_s11 = sshll.u32 %s1466_s8, 3  ;;  %s833_s20 = sshll.u32 %s1288_s28, 7 }
  0x87   : > { %883 = vmatprep.subr.bf16.mxu1 %v1224_v0  ;;  %899 = vmatprep.mubr.msk.bf16.mxu1 %vm1225_vm0, %v1224_v0  ;;  %v1013_v6 = vld [vmem:[#allocation7 + $0x8] sm:$0xff]   ;;  %v1008_v7 = vld [vmem:[#allocation5 + $0x20] sm:$0xff]   ;;  %v1014_v8 = vld [vmem:[#allocation7 + $0x10] sm:$0xff]   ;;  %s337_s15 = scalar_lea.vmem [#allocation10], %s804_s11  ;;  %s1529_s21 = scalar_lea.hbm %s1580_s7, %s833_s20 }
  0x88   : > { %864 = vmatpush3.bf16.msra.mxu0 %v1004_v1  ;;  %884 = vmatpush3.bf16.msra.mxu1 %v1012_v4  ;;  %v1009_v9 = vld [vmem:[#allocation5 + $0x28] sm:$0xff]   ;;  %v1015_v10 = vld [vmem:[#allocation7 + $0x18] sm:$0xff]   ;;  %v1010_v11 = vld [vmem:[#allocation5 + $0x30] sm:$0xff]   ;;  %s692_s29 = sshll.u32 %s337_s15, 4  ;;  %s1226_s30 = smov [#allocation10]   ;;  %s1531_s29 = int_to_ptr.vmem [resolvable:$true] %s692_s29 }
  0x89   : > { %865 = vmatprep.subr.bf16.mxu0 %v1224_v0  ;;  %885 = vmatprep.subr.bf16.mxu1 %v1224_v0  ;;  %v1016_v12 = vld [vmem:[#allocation7 + $0x20] sm:$0xff]   ;;  %v1011_v13 = vld [vmem:[#allocation5 + $0x38] sm:$0xff]   ;;  %v1017_v14 = vld [vmem:[#allocation7 + $0x28] sm:$0xff]   ;;  %s1142_s28 = scalar_lea.vmem %s1531_s29, 128  ;;  %s1146_s9 = sshll.u32 %s1226_s30, 4  ;;  %s1147_s9 = int_to_ptr.vmem [resolvable:$false] %s1146_s9 }
  0x8a   : > { %v339_v15 = vld [vmem:[%s1470_s16] sm:$0xf]  ;;  %v1018_v16 = vld [vmem:[#allocation7 + $0x30] sm:$0xff]   ;;  %v1020_v18 = vld [vmem:[#allocation8] sm:$0xff]   ;;  %s679_s16 = scalar_lea.sflag [#allocation4], %s1466_s8  ;;  %p1143_p10 = scmp.ne.s32.totalorder %s1531_s29, %s1142_s28 }
  0x8b   : > { %v1019_v17 = vld [vmem:[#allocation7 + $0x38] sm:$0xff]   ;;  %v1021_v19 = vld [vmem:[#allocation8 + $0x8] sm:$0xff]   ;;  %v1022_v20 = vld [vmem:[#allocation8 + $0x10] sm:$0xff]   ;;  %s1148_s23 = scalar_lea.vmem %s1147_s9, 256  ;;  %p1149_p12 = scmp.lt.s32.totalorder %s1531_s29, %s1147_s9 }
  0x8c   : > { %866 = vmatpush3.bf16.msra.mxu0 %v1005_v2  ;;  %886 = vmatpush3.bf16.msra.mxu1 %v1013_v6  ;;  %v1023_v21 = vld [vmem:[#allocation8 + $0x18] sm:$0xff]   ;;  %v1024_v22 = vld [vmem:[#allocation8 + $0x20] sm:$0xff]   ;;  %v1025_v23 = vld [vmem:[#allocation8 + $0x28] sm:$0xff]   ;;  %p1144_p3 = pnand %p1143_p10, %p1421_p5  ;;  %p1150_p1 = scmp.lt.s32.totalorder %s1148_s23, %s1142_s28 }
  0x8d   : > { %867 = vmatprep.subr.bf16.mxu0 %v1224_v0  ;;  %887 = vmatprep.subr.bf16.mxu1 %v1224_v0  ;;  %v805_v24 = vld [vmem:[%s1575_s2] ss:$0 sm:$0xff]  ;;  %v1026_v32 = vld [vmem:[#allocation8 + $0x30] sm:$0xff]  }
  0x8e   : > { %v1027_v33 = vld [vmem:[#allocation8 + $0x38] sm:$0xff]   ;;  %p1145_p7 = pneg %p1144_p3  ;;  %p1151_p2 = por %p1150_p1, %p1149_p12 }
  0x8f   : > { %v814_v34 = vld [vmem:[%s1577_s4] ss:$0 sm:$0xff] }
  0x90   : > { %868 = vmatpush3.bf16.msra.mxu0 %v1006_v3  ;;  %888 = vmatpush3.bf16.msra.mxu1 %v1014_v8  ;;  %v823_v42 = vld [vmem:[%s1579_s6] ss:$0 sm:$0xff]  ;;  %p1152_p4 = pnand %p1151_p2, %p1145_p7 }
  0x91   : > { %869 = vmatprep.subr.bf16.mxu0 %v1224_v0  ;;  %889 = vmatprep.subr.bf16.mxu1 %v1224_v0 }
  0x94   : > { %870 = vmatpush3.bf16.msra.mxu0 %v1007_v5  ;;  %890 = vmatpush3.bf16.msra.mxu1 %v1015_v10 }
  0x95   : > { %871 = vmatprep.subr.bf16.mxu0 %v1224_v0  ;;  %891 = vmatprep.subr.bf16.mxu1 %v1224_v0 }
  0x98   : > { %872 = vmatpush3.bf16.msra.mxu0 %v1008_v7  ;;  %892 = vmatpush3.bf16.msra.mxu1 %v1016_v12 }
  0x99   : > { %873 = vmatprep.subr.bf16.mxu0 %v1224_v0  ;;  %893 = vmatprep.subr.bf16.mxu1 %v1224_v0 }
  0x9c   : > { %874 = vmatpush3.bf16.msra.mxu0 %v1009_v9  ;;  %894 = vmatpush3.bf16.msra.mxu1 %v1017_v14 }
  0x9d   : > { %875 = vmatprep.subr.bf16.mxu0 %v1224_v0  ;;  %895 = vmatprep.subr.bf16.mxu1 %v1224_v0 }
  0xa0   : > { %876 = vmatpush3.bf16.msra.mxu0 %v1010_v11  ;;  %896 = vmatpush3.bf16.msra.mxu1 %v1018_v16 }
  0xa1   : > { %877 = vmatprep.subr.bf16.mxu0 %v1224_v0  ;;  %897 = vmatprep.subr.bf16.mxu1 %v1224_v0 }
  0xa4   : > { %878 = vmatpush3.bf16.msra.mxu0 %v1011_v13  ;;  %898 = vmatpush3.bf16.msra.mxu1 %v1019_v17 }
  0xa5   : > { %903 = vmatprep.subr.bf16.mxu0 %v1224_v0 }
  0xa7   : > { %880 = vmatmul.mubr.bf16.vlgmr.msra.gmra.mrb[0].mxu0 %v339_v15 }
  0xa8   : > { %919 = vmatprep.mubr.msk.bf16.mxu0 %vm1225_vm0, %v1224_v0  ;;  %904 = vmatpush3.bf16.msra.mxu0 %v1020_v18 }
  0xa9   : > { %905 = vmatprep.subr.bf16.mxu0 %v1224_v0 }
  0xac   : > { %906 = vmatpush3.bf16.msra.mxu0 %v1021_v19 }
  0xad   : > { %907 = vmatprep.subr.bf16.mxu0 %v1224_v0 }
  0xb0   : > { %908 = vmatpush3.bf16.msra.mxu0 %v1022_v20 }
  0xb1   : > { %909 = vmatprep.subr.bf16.mxu0 %v1224_v0 }
  0xb4   : > { %910 = vmatpush3.bf16.msra.mxu0 %v1023_v21 }
  0xb5   : > { %911 = vmatprep.subr.bf16.mxu0 %v1224_v0 }
  0xb8   : > { %912 = vmatpush3.bf16.msra.mxu0 %v1024_v22 }
  0xb9   : > { %913 = vmatprep.subr.bf16.mxu0 %v1224_v0 }
  0xbc   : > { %914 = vmatpush3.bf16.msra.mxu0 %v1025_v23 }
  0xbd   : > { %915 = vmatprep.subr.bf16.mxu0 %v1224_v0 }
  0xc0   : > { %916 = vmatpush3.bf16.msra.mxu0 %v1026_v32 }
  0xc1   : > { %917 = vmatprep.subr.bf16.mxu0 %v1224_v0 }
  0xc4   : > { %918 = vmatpush3.bf16.msra.mxu0 %v1027_v33 }
 0x17a   : > { %v445_v25 = vpop.f32.mrb[0].mxu0 }
 0x17b   : > { %v446_v26 = vadd.f32 %v805_v24, %v445_v25  ;;  %v881_v27 = vpop.f32.mrb[1].mxu0 }
 0x17c   : > { %v448_v28 = vpop.f32.mrb[2].mxu0 }
 0x17d   : > { %v451_v29 = vmax.f32 %v446_v26, 0.0  ;;  %v882_v30 = vpop.f32.mrb[3].mxu0 }
 0x17f   : > { %v452_v31 = vpack.c.bf16 %v451_v29, %v451_v29 }
 0x181   : > { %900 = vmatmul.mubr.bf16.vlgmr.msra.gmra.mrb[0].mxu1 %v452_v31 }
 0x254   : > { %v558_v35 = vpop.f32.mrb[0].mxu1 }
 0x255   : > { %v559_v36 = vadd.f32 %v814_v34, %v558_v35  ;;  %v901_v37 = vpop.f32.mrb[1].mxu1 }
 0x256   : > { %v561_v38 = vpop.f32.mrb[2].mxu1 }
 0x257   : > { %v564_v39 = vmax.f32 %v559_v36, 0.0  ;;  %v902_v40 = vpop.f32.mrb[3].mxu1 }
 0x259   : > { %v565_v41 = vpack.c.bf16 %v564_v39, %v564_v39 }
 0x25b   : > { %920 = vmatmul.mubr.bf16.vlgmr.msra.gmra.mrb[4].mxu0 %v565_v41 }
 0x32e   : > { %v671_v43 = vpop.f32.mrb[4].mxu0 }
 0x32f   : > { %v672_v44 = vadd.f32 %v823_v42, %v671_v43  ;;  %v921_v45 = vpop.f32.mrb[5].mxu0 }
 0x330   : > { %v674_v46 = vpop.f32.mrb[6].mxu0 }
 0x331   : > { %677 = vst [vmem:[%s337_s15] sm:$0xff] %v672_v44  ;;  %v922_v47 = vpop.f32.mrb[7].mxu0 }
 0x332   : > { %1155 = shalt.err (!%p1152_p4)
}
 0x333   : > { %s1156_s8 = scalar_lea.hbm %s1529_s21, 128  ;;  %s1160_s14 = scalar_lea.hbm %s1580_s7, 256 }
 0x334   : > { %p1157_p0 = scmp.ne.s32.totalorder %s1529_s21, %s1156_s8  ;;  %p1161_p8 = scmp.lt.u32.totalorder %s1529_s21, %s1580_s7 }
 0x335   : > { %p1162_p13 = scmp.lt.u32.totalorder %s1160_s14, %s1156_s8  ;;  %p1164_p10 = scmp.lt.u32.totalorder %s1156_s8, %s1529_s21 }
 0x336   : > { %p1158_p9 = pnand %p1157_p0, %p1421_p5 }
 0x337   : > { %p1163_p6 = por %p1162_p13, %p1161_p8 }
 0x338   : > { %p1159_p11 = pneg %p1158_p9 }
 0x339   : > { %p1165_p3 = por %p1164_p10, %p1163_p6 }
 0x33b   : > { %p1166_p7 = pnand %p1165_p3, %p1159_p11 }
 0x33d   : > { %1169 = shalt.err (!%p1166_p7)
}
 0x33e   : > { %937 = dma.vmem_to_hbm [thread:$0]  (%p1421_p5), %s1531_s29, 128, %s1529_s21, %s679_s16  }
 0x33f PF: > { %s1600_s15 = sld [smem:[#allocation15_spill]]  ;;  %s704_s12 = sand.u32 1, %s1204_s24  }
 0x340   : > { %p1602_p1 = scmp.ge.s32.totalorder %s1216_s27, 2  ;;  %s705_s17 = scalar_lea.sflag [#allocation4], %s704_s12 }
 0x345   : > { %p1601_p12 = scmp.ne.s32.totalorder %s1600_s15, 0 }
 0x347   : > { %p954_p2 = pnand %p1602_p1, %p1601_p12 }
 0x349   : > { %1199 = dma.done.wait (!%p954_p2), %s705_s17, 128  }
 0x34a   : > { %1201 = vsyncadd (!%p954_p2), %s705_s17, 4294967168  ;;  %p22_p4 = scmp.ge.s32.totalorder %s1407_s22, 4   ;;  %s1603_s24 = smov %s1208_s25 }
 0x34b   : > { %s1604_s25 = smov %s1212_s26  ;;  %s1605_s26 = smov %s1417_s18 }
 0x34c   : > { %s1606_s27 = smov %s1407_s22  ;;  %24 = sbr.rel (!%p22_p4) target bundleno = 7 (0x7), region = 105 }
 0x353   :  { %710 = vsyncpa [#allocation3], 1 }
 0x354   :  { %712 = vsyncpa [#allocation3 + $0x1], 1 }
 0x355   :  { %713 = vsyncpa [#allocation6], 1 }
 0x356   :  { %714 = vsyncpa [#allocation9], 1 }
 0x357   :  { %715 = vsyncpa [#allocation4], 1 }
 0x358   :  { %717 = vsyncpa [#allocation4 + $0x1], 1 }

</bundles_post_ra>
